<compile_context>
chip_gen: v5e
topology: v5e:2x2
jax: 0.10.0
libtpu: 0.0.40
codegen_flags: <defaults>
</compile_context>

<pallas_src>
import functools

import jax
import jax.numpy as jnp
from jax.experimental import pallas as pl
from jax.experimental.pallas import tpu as pltpu

_LANES = 128
_DEFAULT_ROW_BLOCK = 1024  # (1024, 128) f32 tile = 512 KiB per input buffer


def _round_up(x, m):
    return ((x + m - 1) // m) * m


def _mse_sum_kernel(x_ref, t_ref, o_ref, acc_ref):
    """Accumulate sum((x - t)^2) lane-resident; emit per-shard partials."""
    i = pl.program_id(1)  # reduction ("arbitrary") axis

    @pl.when(i == 0)
    def _():
        acc_ref[...] = jnp.zeros_like(acc_ref)

    d = x_ref[...].astype(jnp.float32) - t_ref[...].astype(jnp.float32)
    acc_ref[...] += d * d  # pure VPU elementwise; no per-step reduction

    @pl.when(i == pl.num_programs(1) - 1)
    def _():
        # One-time reduce of the (rb, 128) accumulator down to an (8, 128)
        # vreg of lane/sublane partials (trace-time unrolled vector adds).
        a = acc_ref[...]
        rb = a.shape[0]
        p = a[0:8]
        for r in range(8, rb, 8):
            p = p + a[r:r + 8]
        o_ref[0] = p


def _prepare_2d(x, padded_rows):
    """Flatten to (padded_rows, 128) in the NATIVE dtype, zero-padding tail."""
    flat = x.reshape(-1)
    pad = padded_rows * _LANES - flat.shape[0]
    if pad:
        flat = jnp.pad(flat, (0, pad))
    return flat.reshape(padded_rows, _LANES)


def _tiling(total, row_block):
    rows = pl.cdiv(total, _LANES)
    rb = min(row_block, _round_up(rows, 8))
    rb = _round_up(rb, 8)
    steps_total = pl.cdiv(rows, rb)
    n_shards = 2 if steps_total >= 2 else 1   # split rows across TensorCores
    steps_per_shard = pl.cdiv(steps_total, n_shards)
    padded_rows = n_shards * steps_per_shard * rb
    return rb, n_shards, steps_per_shard, padded_rows


def _sq_diff_partials(x2d, t2d, rb, n_shards, steps_per_shard):
    padded_rows, lanes = x2d.shape
    in_bytes = (padded_rows * lanes *
                (jnp.dtype(x2d.dtype).itemsize + jnp.dtype(t2d.dtype).itemsize))
    tile_bytes = rb * lanes * max(jnp.dtype(x2d.dtype).itemsize,
                                  jnp.dtype(t2d.dtype).itemsize)
    # 2 inputs x 2 pipeline buffers x tile + f32 accumulator + output, w/ margin.
    vmem_needed = 4 * tile_bytes + rb * lanes * 4 + n_shards * 8 * lanes * 4
    vmem_limit = int(min(max(2 * vmem_needed, 16 * 1024 * 1024),
                         48 * 1024 * 1024))

    n_elems = padded_rows * lanes
    cost = pl.CostEstimate(
        flops=3 * n_elems,             # sub, mul, add per element
        transcendentals=0,
        bytes_accessed=in_bytes + n_shards * 8 * lanes * 4,
    )

    return pl.pallas_call(
        _mse_sum_kernel,
        out_shape=jax.ShapeDtypeStruct((n_shards, 8, lanes), jnp.float32),
        grid_spec=pltpu.PrefetchScalarGridSpec(
            num_scalar_prefetch=0,
            grid=(n_shards, steps_per_shard),
            in_specs=[
                pl.BlockSpec((rb, lanes),
                             lambda s, i: (s * steps_per_shard + i, 0)),
                pl.BlockSpec((rb, lanes),
                             lambda s, i: (s * steps_per_shard + i, 0)),
            ],
            out_specs=pl.BlockSpec((1, 8, lanes), lambda s, i: (s, 0, 0)),
            scratch_shapes=[pltpu.VMEM((rb, lanes), jnp.float32)],
        ),
        compiler_params=pltpu.CompilerParams(
            dimension_semantics=("parallel", "arbitrary"),
            vmem_limit_bytes=vmem_limit,
        ),
        cost_estimate=cost,
    )(x2d, t2d)


def _content_loss_impl(inp, target, row_block=_DEFAULT_ROW_BLOCK):
    assert inp.shape == target.shape, "input / target feature maps must match"
    total = 1
    for s in inp.shape:
        total *= s
    rb, n_shards, steps_per_shard, padded_rows = _tiling(total, row_block)
    x2d = _prepare_2d(inp, padded_rows)
    t2d = _prepare_2d(target, padded_rows)
    partials = _sq_diff_partials(x2d, t2d, rb, n_shards, steps_per_shard)
    return jnp.sum(partials) / jnp.float32(total)


@jax.custom_vjp
def content_loss(inp, target):
    """mean((inp - target)**2), forward computed in a Pallas TPU kernel."""
    return _content_loss_impl(inp, target)


def _content_loss_fwd(inp, target):
    return _content_loss_impl(inp, target), (inp, target)


def _content_loss_bwd(res, g):
    inp, target = res
    n = 1
    for s in inp.shape:
        n *= s
    d = inp.astype(jnp.float32) - target.astype(jnp.float32)
    gi = (2.0 / n) * g * d
    # target is detached in the PyTorch module -> zero cotangent.
    return gi.astype(inp.dtype), jnp.zeros_like(target)


content_loss.defvjp(_content_loss_fwd, _content_loss_bwd)


class ContentLossPallas:
    """Mirrors the PyTorch ContentLoss module: holds a fixed (detached) target."""

    def __init__(self, target):
        self.target = jax.lax.stop_gradient(jnp.asarray(target))

    def __call__(self, inp):
        return content_loss(inp, self.target)


if __name__ == "__main__":
    key = jax.random.PRNGKey(0)
    k_t, k_x, k_t2, k_x2 = jax.random.split(key, 4)

    # Small NCHW feature maps: batch=2, channels=4, spatial=16x16.
    target = jax.random.normal(k_t, (2, 4, 16, 16), dtype=jnp.float32)
    x = jax.random.normal(k_x, (2, 4, 16, 16), dtype=jnp.float32)

    module = ContentLossPallas(target)
    loss = jax.block_until_ready(module(x))
    ref = jnp.mean((x - target) ** 2)
    assert jnp.allclose(loss, ref, rtol=1e-5, atol=1e-6), (loss, ref)

    # Ragged shape + small row_block: exercises zero-padding, multi-step
    # reduction ("arbitrary" axis) and the 2-shard "parallel" axis.
    t2 = jax.random.normal(k_t2, (2, 4, 33, 33), dtype=jnp.float32)
    x2 = jax.random.normal(k_x2, (2, 4, 33, 33), dtype=jnp.float32)
    loss2 = jax.block_until_ready(_content_loss_impl(x2, t2, row_block=16))
    ref2 = jnp.mean((x2 - t2) ** 2)
    assert jnp.allclose(loss2, ref2, rtol=1e-5, atol=1e-6), (loss2, ref2)

    # Gradient path (custom_vjp): d/dx mean((x - t)^2) = 2 (x - t) / N.
    g = jax.block_until_ready(jax.grad(content_loss)(x, target))
    g_ref = 2.0 * (x - target) / x.size
    assert jnp.allclose(g, g_ref, rtol=1e-5, atol=1e-6), "grad mismatch"

    print("KERNEL_OK")
</pallas_src>

<mosaic_0001>
module attributes {stable_mosaic.version = 11 : i64} {
  func.func @_mse_sum_kernel(%arg0: i32, %arg1: i32, %arg2: memref<16x128xf32, #tpu.memory_space<vmem>>, %arg3: memref<16x128xf32, #tpu.memory_space<vmem>>, %arg4: memref<1x8x128xf32, #tpu.memory_space<vmem>>, %arg5: memref<16x128xf32, #tpu.memory_space<vmem>>) attributes {dimension_semantics = [#tpu.dimension_semantics<parallel>, #tpu.dimension_semantics<arbitrary>], iteration_bounds = array<i64: 1, 1>, scalar_prefetch = 0 : i64, scratch_operands = 1 : i64, tpu.core_type = #tpu.core_type<tc>, window_params = [{transform_indices = @transform_0, window_bounds = array<i64: 16, 128>}, {transform_indices = @transform_1, window_bounds = array<i64: 16, 128>}, {transform_indices = @transform_2, window_bounds = array<i64: 1, 8, 128>}]} {
    %c0_i32 = arith.constant 0 : i32
    %0 = arith.cmpi eq, %arg1, %c0_i32 : i32
    %1 = arith.extui %0 : i1 to i32
    %c0_i32_0 = arith.constant 0 : i32
    %2 = arith.cmpi ne, %1, %c0_i32_0 : i32
    scf.if %2 {
      %cst = arith.constant 0.000000e+00 : f32
      %13 = vector.broadcast %cst : f32 to vector<16x128xf32>
      %c0_10 = arith.constant 0 : index
      %c0_11 = arith.constant 0 : index
      %14 = vector.load %arg5[%c0_10, %c0_11] : memref<16x128xf32, #tpu.memory_space<vmem>>, vector<16x128xf32>
      tpu.vector_store %arg5[%c0_10, %c0_11], %13 {strides = array<i32>} : memref<16x128xf32, #tpu.memory_space<vmem>>, vector<16x128xf32>,
    } else {
    }
    %c0 = arith.constant 0 : index
    %c0_1 = arith.constant 0 : index
    %3 = vector.load %arg2[%c0, %c0_1] : memref<16x128xf32, #tpu.memory_space<vmem>>, vector<16x128xf32>
    %c0_2 = arith.constant 0 : index
    %c0_3 = arith.constant 0 : index
    %4 = vector.load %arg3[%c0_2, %c0_3] : memref<16x128xf32, #tpu.memory_space<vmem>>, vector<16x128xf32>
    %5 = arith.subf %3, %4 : vector<16x128xf32>
    %c0_4 = arith.constant 0 : index
    %c0_5 = arith.constant 0 : index
    %6 = vector.load %arg5[%c0_4, %c0_5] : memref<16x128xf32, #tpu.memory_space<vmem>>, vector<16x128xf32>
    %7 = arith.mulf %5, %5 : vector<16x128xf32>
    %8 = arith.addf %6, %7 : vector<16x128xf32>
    %c0_6 = arith.constant 0 : index
    %c0_7 = arith.constant 0 : index
    %9 = vector.load %arg5[%c0_6, %c0_7] : memref<16x128xf32, #tpu.memory_space<vmem>>, vector<16x128xf32>
    tpu.vector_store %arg5[%c0_6, %c0_7], %8 {strides = array<i32>} : memref<16x128xf32, #tpu.memory_space<vmem>>, vector<16x128xf32>,
    %c0_i32_8 = arith.constant 0 : i32
    %10 = arith.cmpi eq, %arg1, %c0_i32_8 : i32
    %11 = arith.extui %10 : i1 to i32
    %c0_i32_9 = arith.constant 0 : i32
    %12 = arith.cmpi ne, %11, %c0_i32_9 : i32
    scf.if %12 {
      %c0_10 = arith.constant 0 : index
      %c0_11 = arith.constant 0 : index
      %13 = vector.load %arg5[%c0_10, %c0_11] : memref<16x128xf32, #tpu.memory_space<vmem>>, vector<16x128xf32>
      %14 = vector.extract_strided_slice %13 {offsets = [0, 0], sizes = [8, 128], strides = [1, 1]} : vector<16x128xf32> to vector<8x128xf32>
      %15 = vector.extract_strided_slice %13 {offsets = [8, 0], sizes = [8, 128], strides = [1, 1]} : vector<16x128xf32> to vector<8x128xf32>
      %16 = arith.addf %14, %15 : vector<8x128xf32>
      %c0_12 = arith.constant 0 : index
      %c0_13 = arith.constant 0 : index
      %c0_14 = arith.constant 0 : index
      %17 = vector.load %arg4[%c0_12, %c0_13, %c0_14] : memref<1x8x128xf32, #tpu.memory_space<vmem>>, vector<1x8x128xf32>
      %18 = vector.shape_cast %17 : vector<1x8x128xf32> to vector<8x128xf32>
      %19 = vector.shape_cast %16 : vector<8x128xf32> to vector<1x8x128xf32>
      tpu.vector_store %arg4[%c0_12, %c0_13, %c0_14], %19 {strides = array<i32>} : memref<1x8x128xf32, #tpu.memory_space<vmem>>, vector<1x8x128xf32>,
    } else {
    }
    return
  }
  func.func @transform_0(%arg0: i32, %arg1: i32) -> (i32, i32) {
    %c1_i32 = arith.constant 1 : i32
    %0 = arith.muli %arg0, %c1_i32 : i32
    %1 = arith.addi %0, %arg1 : i32
    %c0_i32 = arith.constant 0 : i32
    %c0_i32_0 = arith.constant 0 : i32
    return %1, %c0_i32 : i32, i32
  }
  func.func @transform_1(%arg0: i32, %arg1: i32) -> (i32, i32) {
    %c1_i32 = arith.constant 1 : i32
    %0 = arith.muli %arg0, %c1_i32 : i32
    %1 = arith.addi %0, %arg1 : i32
    %c0_i32 = arith.constant 0 : i32
    %c0_i32_0 = arith.constant 0 : i32
    return %1, %c0_i32 : i32, i32
  }
  func.func @transform_2(%arg0: i32, %arg1: i32) -> (i32, i32, i32) {
    %c0_i32 = arith.constant 0 : i32
    %c0_i32_0 = arith.constant 0 : i32
    %c0_i32_1 = arith.constant 0 : i32
    return %arg0, %c0_i32, %c0_i32_0 : i32, i32, i32
  }
}

</mosaic_0001>

<bundles_post_ra>
// kernel: tpu_custom_call.1
= control target key start
LH: loop header
LB: loop body
LE: loop exit
PB: predicated region body
PF: predicated region fallthrough
CT: control target
= control target key end

     0   :  { %7 = vsyncpa [#allocation4], 0  ;;  %s213_s0 = inlined_call_operand.hbm [shape: f32[16,128], index: 0, kind: input, shape index: {}]   ;;  %s214_s1 = inlined_call_operand.hbm [shape: f32[16,128], index: 1, kind: input, shape index: {}]   ;;  %s215_s2 = inlined_call_operand.hbm [shape: f32[1,8,128], index: 2, kind: output, shape index: {}]  }
   0x1   :  { %8 = vsyncpa [#allocation7], 0 }
   0x2   :  { %9 = vsyncpa [#allocation5], 0  ;;  %s18_s11 = sshll.u32 %s213_s0, 4  ;;  %s184_s12 = smov [#allocation3]   ;;  %s19_s11 = int_to_ptr.hbm [resolvable:$true] %s18_s11 }
   0x3   :  { %s20_s13 = sshll.u32 %s184_s12, 4  ;;  %s35_s16 = sshll.u32 %s214_s1, 4  ;;  %s21_s13 = int_to_ptr.vmem [resolvable:$true] %s20_s13  ;;  %s36_s16 = int_to_ptr.hbm [resolvable:$true] %s35_s16 }
   0x4   :  { %s185_s17 = smov 128   ;;  %s186_s18 = smov 8  }
   0x5   :  { %26 = dma.hbm_to_vmem [thread:$0]  %s19_s11, 256, %s21_s13, [#allocation4], %s185_s17, %s185_s17, %s186_s18  }
   0x6   :  { %s187_s19 = smov [#allocation6]  }
   0x7   :  { %s37_s20 = sshll.u32 %s187_s19, 4  ;;  %s38_s20 = int_to_ptr.vmem [resolvable:$true] %s37_s20 }
   0x8   :  { %43 = dma.hbm_to_vmem [thread:$0]  %s36_s16, 256, %s38_s20, [#allocation7], %s185_s17, %s185_s17, %s186_s18  }
   0x9   :  { %178 = dma.done.wait [#allocation4], 256  }
   0xa   :  { %179 = vsyncadd [#allocation4], 4294967040 }
   0xb   :  { %180 = dma.done.wait [#allocation7], 256  }
   0xc   :  { %181 = vsyncadd [#allocation7], 4294967040  ;;  %v62_v0 = vld [vmem:[#allocation3] sm:$0xff]  ;;  %v63_v1 = vld [vmem:[#allocation3 + $0x8] sm:$0xff]  ;;  %s188_s0 = smov [#allocation8]   ;;  %s90_s23 = sshll.u32 %s215_s2, 4  ;;  %s91_s23 = int_to_ptr.hbm [resolvable:$true] %s90_s23 }
   0xd   :  { %v64_v2 = vld [vmem:[#allocation6] sm:$0xff]  ;;  %v65_v3 = vld [vmem:[#allocation6 + $0x8] sm:$0xff]  ;;  %s88_s1 = sshll.u32 %s188_s0, 4  ;;  %s89_s1 = int_to_ptr.vmem [resolvable:$true] %s88_s1 }
   0xe   :  { %v66_v4 = vsub.f32 %v62_v0, %v64_v2  ;;  %v67_v5 = vsub.f32 %v63_v1, %v65_v3 }
  0x10   :  { %v70_v6 = vmul.f32 %v66_v4, %v66_v4  ;;  %v71_v7 = vmul.f32 %v67_v5, %v67_v5 }
  0x12   :  { %v81_v8 = vadd.f32 %v71_v7, %v70_v6 }
  0x14   :  { %82 = vst [vmem:[#allocation8] sm:$0xff] %v81_v8 }
  0x15   :  { %93 = dma.vmem_to_hbm [thread:$0]  %s89_s1, 128, %s91_s23, [#allocation5]  }
  0x16   :  { %182 = dma.done.wait [#allocation5], 128  }
  0x17   :  { %183 = vsyncadd [#allocation5], 4294967168 }
  0x18   :  { %98 = vsyncpa [#allocation4], 1 }
  0x19   :  { %99 = vsyncpa [#allocation7], 1 }
  0x1a   :  { %100 = vsyncpa [#allocation5], 1 }

</bundles_post_ra>
